<compile_context>
chip_gen: v6e
topology: v6e:2x2x1
jax: 0.10.0
libtpu: 0.0.40
codegen_flags: <defaults>
</compile_context>

<pallas_src>
import functools

import numpy as np

import jax
import jax.numpy as jnp
from jax.experimental import pallas as pl
from jax.experimental.pallas import tpu as pltpu


def _round_up(x: int, m: int) -> int:
    return ((x + m - 1) // m) * m


def _mlp_fused_kernel(*refs, n_layers: int):
    """Fused MLP over one batch tile.

    refs layout (positional):
      refs[0]              : x tile   (TILE_B, Din)       VMEM (pipelined)
      refs[1 + 2*l]        : weight l (d_in_l, d_out_l)   VMEM (resident, 1-buffered)
      refs[2 + 2*l]        : bias l   (1, d_out_l) f32    VMEM (resident, 1-buffered)
      refs[1 + 2*n_layers] : out tile (TILE_B, Dout)      VMEM (pipelined)
    """
    x_ref = refs[0]
    o_ref = refs[1 + 2 * n_layers]

    h = x_ref[...]
    for layer in range(n_layers):
        w_ref = refs[1 + 2 * layer]
        b_ref = refs[2 + 2 * layer]
        # MXU matmul with f32 accumulation; f32 bias-add epilogue on the VPU.
        y = jnp.dot(h, w_ref[...], preferred_element_type=jnp.float32)
        y = y + b_ref[...]
        if layer < n_layers - 1:
            # eval-mode dropout == identity; ReLU on the VPU.  The hidden
            # activation stays in vregs (no VMEM scratch round-trip) and is
            # cast back to the compute dtype for the next MXU pass.
            h = jnp.maximum(y, 0.0).astype(w_ref.dtype)
        else:
            o_ref[...] = y.astype(o_ref.dtype)


def prepare_params(params, compute_dtype=jnp.bfloat16):
    """One-time (outside the hot path) prep of the parameters.

    Weights -> compute_dtype (bf16 is MXU-native on v5e/v6e/v7x and halves
    HBM/VMEM bytes).  Biases stay f32 (they feed the f32 epilogue).  Call once
    and reuse the result for every mlp_forward call.
    """
    prepped = []
    for w, b in params:
        prepped.append(
            (jnp.asarray(w, compute_dtype), jnp.asarray(b, jnp.float32).reshape(1, -1))
        )
    return prepped


@functools.partial(jax.jit, static_argnames=("tile_b",))
def mlp_forward(x, prepared_params, *, tile_b: int = 512):
    """MLP forward.  x: (B, n_inputs) f32.  prepared_params: list of
    (W (din, dout) in compute dtype, b (1, dout) f32) from prepare_params()."""
    B, Din = x.shape
    out_dtype = x.dtype
    n_layers = len(prepared_params)
    compute_dtype = prepared_params[0][0].dtype

    dims = [Din] + [w.shape[1] for (w, _) in prepared_params]
    Dout = dims[-1]

    # Batch tiling: sublane multiple tracks the packed layout (16 for bf16,
    # 8 for f32); tb is capped at ~B/2 so moderate B still yields >= 2 grid
    # steps (megacore sharding on v7x + activation-tile double buffering).
    sublane = 16 if compute_dtype == jnp.dtype(jnp.bfloat16) else 8
    half_b = _round_up(max((B + 1) // 2, 1), sublane)
    tb = min(tile_b, half_b)
    b_pad = _round_up(B, tb)

    x_c = x.astype(compute_dtype)
    if b_pad != B:
        x_c = jnp.pad(x_c, ((0, b_pad - B), (0, 0)))

    # Feature dims are passed unpadded: block last dims equal the full array
    # dims (legal per the (8,128) rule), avoiding padded-DMA amplification
    # for small Din / n_outputs.  Zero batch-padding is exact.
    flat_inputs = [x_c]
    in_specs = [pl.BlockSpec((tb, Din), lambda i: (i, 0))]
    resident_bytes = 0
    for w, b in prepared_params:
        flat_inputs += [w, b]
        in_specs += [
            # Constant block index -> DMA'd once, resident in VMEM; Buffered(1)
            # drops the useless second pipeline buffer (halves resident VMEM).
            pl.BlockSpec(w.shape, lambda i: (0, 0), pipeline_mode=pl.Buffered(1)),
            pl.BlockSpec(b.shape, lambda i: (0, 0), pipeline_mode=pl.Buffered(1)),
        ]
        resident_bytes += int(w.size) * w.dtype.itemsize + int(b.size) * b.dtype.itemsize

    # Explicit scoped-VMEM budget: 2x pipelined activation tiles (in + out),
    # 1x resident weights/biases, plus headroom for Mosaic internal scratch.
    c_item = jnp.dtype(compute_dtype).itemsize
    o_item = jnp.dtype(out_dtype).itemsize
    working_set = 2 * tb * Din * c_item + 2 * tb * Dout * o_item + resident_bytes
    vmem_limit = min(max(int(working_set * 1.3) + (4 << 20), 32 << 20), 100 << 20)

    flops = sum(2 * b_pad * din * dout for din, dout in zip(dims[:-1], dims[1:]))
    bytes_accessed = sum(int(a.size) * a.dtype.itemsize for a in flat_inputs)
    bytes_accessed += b_pad * Dout * o_item

    out_p = pl.pallas_call(
        functools.partial(_mlp_fused_kernel, n_layers=n_layers),
        out_shape=jax.ShapeDtypeStruct((b_pad, Dout), out_dtype),
        grid_spec=pltpu.PrefetchScalarGridSpec(
            num_scalar_prefetch=0,
            grid=(b_pad // tb,),
            in_specs=in_specs,
            out_specs=pl.BlockSpec((tb, Dout), lambda i: (i, 0)),
        ),
        compiler_params=pltpu.CompilerParams(
            dimension_semantics=("parallel",),
            vmem_limit_bytes=vmem_limit,
        ),
        cost_estimate=pl.CostEstimate(
            flops=flops, transcendentals=0, bytes_accessed=bytes_accessed
        ),
    )(*flat_inputs)

    if b_pad != B:
        return out_p[:B]
    return out_p


def init_mlp_params(key, n_inputs, n_outputs, mlp_width, mlp_depth):
    """Deterministic init mirroring the PyTorch module's shapes.

    Weights are stored as (in_features, out_features) - PyTorch's (out, in)
    transposed.  Biases are (1, out_features).
    """
    dims = [n_inputs] + [mlp_width] * (mlp_depth - 1) + [n_outputs]
    params = []
    for din, dout in zip(dims[:-1], dims[1:]):
        kw, kb, key = jax.random.split(key, 3)
        bound = 1.0 / float(din) ** 0.5  # PyTorch nn.Linear default init range
        w = jax.random.uniform(kw, (din, dout), jnp.float32, -bound, bound)
        b = jax.random.uniform(kb, (1, dout), jnp.float32, -bound, bound)
        params.append((w, b))
    return params


if __name__ == "__main__":
    # Small shapes consistent with the module:
    #   batch=2, n_inputs=16, hparams = {mlp_width: 32, mlp_depth: 3,
    #                                    mlp_dropout: 0.0}, n_outputs=8
    batch = 2
    n_inputs = 16
    n_outputs = 8
    mlp_width = 32
    mlp_depth = 3  # => 1 hidden layer (mlp_depth - 2)

    key = jax.random.PRNGKey(0)
    kx, kp = jax.random.split(key)
    x = jax.random.normal(kx, (batch, n_inputs), dtype=jnp.float32)
    params = init_mlp_params(kp, n_inputs, n_outputs, mlp_width, mlp_depth)

    # Ground-truth reference in float64 numpy (eval mode: dropout == identity).
    ref = np.asarray(x, np.float64)
    for i, (w, b) in enumerate(params):
        ref = ref @ np.asarray(w, np.float64) + np.asarray(b, np.float64)
        if i != len(params) - 1:
            ref = np.maximum(ref, 0.0)

    # f32 compute path.
    params_f32 = prepare_params(params, jnp.float32)
    out_f32 = jax.block_until_ready(mlp_forward(x, params_f32))
    assert out_f32.shape == (batch, n_outputs)
    err_f32 = float(np.max(np.abs(np.asarray(out_f32, np.float64) - ref)))
    # Tolerance covers either full-f32 or MXU bf16-pass decomposition of the dot.
    assert err_f32 < 5e-2, f"f32 path mismatch: {err_f32}"

    # bf16 production path (MXU-native weights/activations, f32 accumulation).
    params_bf16 = prepare_params(params, jnp.bfloat16)
    out_bf16 = jax.block_until_ready(mlp_forward(x, params_bf16))
    assert out_bf16.shape == (batch, n_outputs)
    err_bf16 = float(np.max(np.abs(np.asarray(out_bf16, np.float64) - ref)))
    assert err_bf16 < 2.5e-1, f"bf16 path mismatch: {err_bf16}"

    print("KERNEL_OK")
</pallas_src>

<mosaic_0001>
module attributes {stable_mosaic.version = 11 : i64} {
  func.func @_mlp_fused_kernel(%arg0: i32, %arg1: memref<8x16xf32, #tpu.memory_space<vmem>>, %arg2: memref<16x32xf32, #tpu.memory_space<vmem>>, %arg3: memref<1x32xf32, #tpu.memory_space<vmem>>, %arg4: memref<32x32xf32, #tpu.memory_space<vmem>>, %arg5: memref<1x32xf32, #tpu.memory_space<vmem>>, %arg6: memref<32x8xf32, #tpu.memory_space<vmem>>, %arg7: memref<1x8xf32, #tpu.memory_space<vmem>>, %arg8: memref<8x8xf32, #tpu.memory_space<vmem>>) attributes {dimension_semantics = [#tpu.dimension_semantics<parallel>], iteration_bounds = array<i64: 1>, scalar_prefetch = 0 : i64, scratch_operands = 0 : i64, tpu.core_type = #tpu.core_type<tc>, window_params = [{transform_indices = @transform_0, window_bounds = array<i64: 8, 16>}, {pipeline_mode = #tpu.pipeline_mode<synchronous>, transform_indices = @transform_1, window_bounds = array<i64: 16, 32>}, {pipeline_mode = #tpu.pipeline_mode<synchronous>, transform_indices = @transform_2, window_bounds = array<i64: 1, 32>}, {pipeline_mode = #tpu.pipeline_mode<synchronous>, transform_indices = @transform_3, window_bounds = array<i64: 32, 32>}, {pipeline_mode = #tpu.pipeline_mode<synchronous>, transform_indices = @transform_4, window_bounds = array<i64: 1, 32>}, {pipeline_mode = #tpu.pipeline_mode<synchronous>, transform_indices = @transform_5, window_bounds = array<i64: 32, 8>}, {pipeline_mode = #tpu.pipeline_mode<synchronous>, transform_indices = @transform_6, window_bounds = array<i64: 1, 8>}, {transform_indices = @transform_7, window_bounds = array<i64: 8, 8>}]} {
    %c0 = arith.constant 0 : index
    %c0_0 = arith.constant 0 : index
    %0 = vector.load %arg1[%c0, %c0_0] : memref<8x16xf32, #tpu.memory_space<vmem>>, vector<8x16xf32>
    %c0_1 = arith.constant 0 : index
    %c0_2 = arith.constant 0 : index
    %1 = vector.load %arg2[%c0_1, %c0_2] : memref<16x32xf32, #tpu.memory_space<vmem>>, vector<16x32xf32>
    %cst = arith.constant dense<0.000000e+00> : vector<8x32xf32>
    %2 = tpu.matmul %0, %1, %cst {dimension_numbers = #tpu.dot_dimension_numbers<[1], [0], [0], [1], [0, 0, 1, 1], [], []>} : vector<8x16xf32>, vector<16x32xf32>, vector<8x32xf32> -> vector<8x32xf32>
    %c0_3 = arith.constant 0 : index
    %c0_4 = arith.constant 0 : index
    %3 = vector.load %arg3[%c0_3, %c0_4] : memref<1x32xf32, #tpu.memory_space<vmem>>, vector<1x32xf32>
    %4 = vector.broadcast %3 : vector<1x32xf32> to vector<8x32xf32>
    %5 = arith.addf %2, %4 : vector<8x32xf32>
    %cst_5 = arith.constant 0.000000e+00 : f32
    %6 = vector.broadcast %cst_5 : f32 to vector<8x32xf32>
    %7 = arith.maximumf %5, %6 : vector<8x32xf32>
    %c0_6 = arith.constant 0 : index
    %c0_7 = arith.constant 0 : index
    %8 = vector.load %arg4[%c0_6, %c0_7] : memref<32x32xf32, #tpu.memory_space<vmem>>, vector<32x32xf32>
    %cst_8 = arith.constant dense<0.000000e+00> : vector<8x32xf32>
    %9 = tpu.matmul %7, %8, %cst_8 {dimension_numbers = #tpu.dot_dimension_numbers<[1], [0], [0], [1], [0, 0, 1, 1], [], []>} : vector<8x32xf32>, vector<32x32xf32>, vector<8x32xf32> -> vector<8x32xf32>
    %c0_9 = arith.constant 0 : index
    %c0_10 = arith.constant 0 : index
    %10 = vector.load %arg5[%c0_9, %c0_10] : memref<1x32xf32, #tpu.memory_space<vmem>>, vector<1x32xf32>
    %11 = vector.broadcast %10 : vector<1x32xf32> to vector<8x32xf32>
    %12 = arith.addf %9, %11 : vector<8x32xf32>
    %cst_11 = arith.constant 0.000000e+00 : f32
    %13 = vector.broadcast %cst_11 : f32 to vector<8x32xf32>
    %14 = arith.maximumf %12, %13 : vector<8x32xf32>
    %c0_12 = arith.constant 0 : index
    %c0_13 = arith.constant 0 : index
    %15 = vector.load %arg6[%c0_12, %c0_13] : memref<32x8xf32, #tpu.memory_space<vmem>>, vector<32x8xf32>
    %cst_14 = arith.constant dense<0.000000e+00> : vector<8x8xf32>
    %16 = tpu.matmul %14, %15, %cst_14 {dimension_numbers = #tpu.dot_dimension_numbers<[1], [0], [0], [1], [0, 0, 1, 1], [], []>} : vector<8x32xf32>, vector<32x8xf32>, vector<8x8xf32> -> vector<8x8xf32>
    %c0_15 = arith.constant 0 : index
    %c0_16 = arith.constant 0 : index
    %17 = vector.load %arg7[%c0_15, %c0_16] : memref<1x8xf32, #tpu.memory_space<vmem>>, vector<1x8xf32>
    %18 = vector.broadcast %17 : vector<1x8xf32> to vector<8x8xf32>
    %19 = arith.addf %16, %18 : vector<8x8xf32>
    %c0_17 = arith.constant 0 : index
    %c0_18 = arith.constant 0 : index
    %20 = vector.load %arg8[%c0_17, %c0_18] : memref<8x8xf32, #tpu.memory_space<vmem>>, vector<8x8xf32>
    tpu.vector_store %arg8[%c0_17, %c0_18], %19 {strides = array<i32>} : memref<8x8xf32, #tpu.memory_space<vmem>>, vector<8x8xf32>,
    return
  }
  func.func @transform_0(%arg0: i32) -> (i32, i32) {
    %c0_i32 = arith.constant 0 : i32
    %c0_i32_0 = arith.constant 0 : i32
    return %arg0, %c0_i32 : i32, i32
  }
  func.func @transform_1(%arg0: i32) -> (i32, i32) {
    %c0_i32 = arith.constant 0 : i32
    %c0_i32_0 = arith.constant 0 : i32
    %c0_i32_1 = arith.constant 0 : i32
    return %c0_i32, %c0_i32_0 : i32, i32
  }
  func.func @transform_2(%arg0: i32) -> (i32, i32) {
    %c0_i32 = arith.constant 0 : i32
    %c0_i32_0 = arith.constant 0 : i32
    %c0_i32_1 = arith.constant 0 : i32
    return %c0_i32, %c0_i32_0 : i32, i32
  }
  func.func @transform_3(%arg0: i32) -> (i32, i32) {
    %c0_i32 = arith.constant 0 : i32
    %c0_i32_0 = arith.constant 0 : i32
    %c0_i32_1 = arith.constant 0 : i32
    return %c0_i32, %c0_i32_0 : i32, i32
  }
  func.func @transform_4(%arg0: i32) -> (i32, i32) {
    %c0_i32 = arith.constant 0 : i32
    %c0_i32_0 = arith.constant 0 : i32
    %c0_i32_1 = arith.constant 0 : i32
    return %c0_i32, %c0_i32_0 : i32, i32
  }
  func.func @transform_5(%arg0: i32) -> (i32, i32) {
    %c0_i32 = arith.constant 0 : i32
    %c0_i32_0 = arith.constant 0 : i32
    %c0_i32_1 = arith.constant 0 : i32
    return %c0_i32, %c0_i32_0 : i32, i32
  }
  func.func @transform_6(%arg0: i32) -> (i32, i32) {
    %c0_i32 = arith.constant 0 : i32
    %c0_i32_0 = arith.constant 0 : i32
    %c0_i32_1 = arith.constant 0 : i32
    return %c0_i32, %c0_i32_0 : i32, i32
  }
  func.func @transform_7(%arg0: i32) -> (i32, i32) {
    %c0_i32 = arith.constant 0 : i32
    %c0_i32_0 = arith.constant 0 : i32
    return %arg0, %c0_i32 : i32, i32
  }
}

</mosaic_0001>

<bundles_post_ra>
// kernel: mlp_forward.1
= control target key start
LH: loop header
LB: loop body
LE: loop exit
PB: predicated region body
PF: predicated region fallthrough
CT: control target
= control target key end

     0   :  { %v337_v0 = vmov 0.0   ;;  %vm338_vm0 = vmmov 0   ;;  %vm36_vm1 = vcmask 130048   ;;  %vm122_vm2 = vcmask 261120   ;;  %s426_s1 = inlined_call_operand.vmem [shape: f32[16,32], index: 1, kind: input, shape index: {}]   ;;  %s427_s0 = inlined_call_operand.vmem [shape: f32[8,16], index: 0, kind: input, shape index: {}]   ;;  %s428_s3 = inlined_call_operand.vmem [shape: f32[32,32], index: 3, kind: input, shape index: {}]   ;;  %s429_s5 = inlined_call_operand.vmem [shape: f32[32,8], index: 5, kind: input, shape index: {}]   ;;  %s430_s2 = inlined_call_operand.vmem [shape: f32[1,32], index: 2, kind: input, shape index: {}]   ;;  %s431_s4 = inlined_call_operand.vmem [shape: f32[1,32], index: 4, kind: input, shape index: {}]   ;;  %s432_s6 = inlined_call_operand.vmem [shape: f32[1,8], index: 6, kind: input, shape index: {}]   ;;  %s433_s7 = inlined_call_operand.vmem [shape: f32[8,8], index: 7, kind: output, shape index: {}]  }
   0x1   :  { %306 = vmatprep.subr.mxu0 %v337_v0  ;;  %v28_v1 = vld [vmem:[%s426_s1 + $0x8] sm:$0xff]  ;;  %v27_v2 = vld [vmem:[%s426_s1] sm:$0xff]  ;;  %310 = vmatprep.mubr.msk.f32.mxu0 %vm338_vm0, %v337_v0  ;;  %v114_v4 = vld [vmem:[%s428_s3 + $0x18] sm:$0xff]  ;;  %vm281_vm3 = vcmask 64512  }
   0x2   :  { %307 = vmatpush3.msra.mxu0 %v28_v1  ;;  %v26_v3 = vld [vmem:[%s427_s0] sm:$0xff]  ;;  %313 = vmatprep.subr.mxu1 %v337_v0  ;;  %v113_v5 = vld [vmem:[%s428_s3 + $0x10] sm:$0xff]  ;;  %v112_v6 = vld [vmem:[%s428_s3 + $0x8] sm:$0xff] }
   0x3   :  { %308 = vmatprep.subr.mxu0 %v337_v0  ;;  %314 = vmatpush3.msra.mxu1 %v114_v4  ;;  %v111_v7 = vld [vmem:[%s428_s3] sm:$0xff]  ;;  %v200_v8 = vld [vmem:[%s429_s5 + $0x18] sm:$0xff]  ;;  %v199_v14 = vld [vmem:[%s429_s5 + $0x10] sm:$0xff] }
   0x4   :  { %309 = vmatpush3.msra.mxu0 %v27_v2  ;;  %315 = vmatprep.subr.mxu1 %v337_v0  ;;  %v287_v9 = vld [vmem:[%s430_s2] ss:$0 sm:$0xff]  ;;  %v198_v15 = vld [vmem:[%s429_s5 + $0x8] sm:$0xff] }
   0x5   :  { %311 = vmatmul.mubr.msk.f32.vlgmr.msra.gmra.mxu0 %vm36_vm1, %v26_v3  ;;  %321 = vmatprep.mubr.msk.f32.mxu1 %vm338_vm0, %v337_v0  ;;  %v197_v16 = vld [vmem:[%s429_s5] sm:$0xff] }
   0x6   :  { %324 = vmatprep.subr.mxu0 %v337_v0  ;;  %332 = vmatprep.mubr.msk.f32.mxu0 %vm338_vm0, %v337_v0  ;;  %v289_v17 = vld [vmem:[%s431_s4] ss:$0 sm:$0xff] }
   0x7   :  { %316 = vmatpush3.msra.mxu1 %v113_v5  ;;  %325 = vmatpush3.msra.mxu0 %v200_v8  ;;  %v291_v22 = vld [vmem:[%s432_s6] ss:$0 sm:$0xff] }
   0x8   :  { %317 = vmatprep.subr.mxu1 %v337_v0  ;;  %326 = vmatprep.subr.mxu0 %v337_v0 }
   0x9   :  { %318 = vmatpush3.msra.mxu1 %v112_v6  ;;  %327 = vmatpush3.msra.mxu0 %v199_v14 }
   0xa   :  { %319 = vmatprep.subr.mxu1 %v337_v0  ;;  %328 = vmatprep.subr.mxu0 %v337_v0 }
   0xb   :  { %320 = vmatpush3.msra.mxu1 %v111_v7  ;;  %329 = vmatpush3.msra.mxu0 %v198_v15 }
   0xc   :  { %330 = vmatprep.subr.mxu0 %v337_v0 }
   0xd   :  { %331 = vmatpush3.msra.mxu0 %v197_v16 }
  0xc5   :  { %v106_v10 = vpop.f32.mrf.mxu0 }
  0xc6   :  { %v107_v11 = vadd.f32 %v287_v9, %v106_v10 }
  0xc7   :  { %v312_v12 = vpop.f32.mrf.mxu0 }
  0xc8   :  { %v110_v13 = vmax.f32 %v107_v11, 0.0 }
  0xca   :  { %322 = vmatmul.mubr.msk.f32.vlgmr.msra.gmra.mxu1 %vm122_vm2, %v110_v13 }
 0x18a   :  { %v192_v18 = vpop.f32.mrf.mxu1 }
 0x18b   :  { %v193_v19 = vadd.f32 %v289_v17, %v192_v18 }
 0x18c   :  { %v323_v20 = vpop.f32.mrf.mxu1 }
 0x18d   :  { %v196_v21 = vmax.f32 %v193_v19, 0.0 }
 0x18f   :  { %333 = vmatmul.mubr.msk.f32.vlgmr.msra.gmra.mxu0 %vm122_vm2, %v196_v21 }
 0x24f   :  { %v277_v23 = vpop.f32.mrf.mxu0 }
 0x250   :  { %v278_v24 = vadd.f32 %v291_v22, %v277_v23 }
 0x251   :  { %v334_v25 = vpop.f32.mrf.mxu0 }
 0x252   :  { %282 = vst.msk [vmem:[%s433_s7] sm:$0xff] %vm281_vm3, %v278_v24 }

</bundles_post_ra>
